<compile_context>
chip_gen: v7x
topology: tpu7x:2x2x1
jax: 0.10.0
libtpu: 0.0.40
codegen_flags: <defaults>
</compile_context>

<pallas_src>
import functools

import jax
import jax.numpy as jnp
from jax.experimental import pallas as pl
from jax.experimental.pallas import tpu as pltpu


def _round_up(n: int, m: int) -> int:
    return ((n + m - 1) // m) * m


def dqn_kernel(x_ref, w1_ref, b1_ref, w2_ref, b2_ref, w3_ref, b3_ref, o_ref):
    # fc1 + ReLU  (bf16 matmul, f32 accumulation, f32 bias)
    h1 = jnp.dot(x_ref[...], w1_ref[...], preferred_element_type=jnp.float32)
    h1 = jnp.maximum(h1 + b1_ref[...], 0.0).astype(jnp.bfloat16)
    # fc2 + ReLU
    h2 = jnp.dot(h1, w2_ref[...], preferred_element_type=jnp.float32)
    h2 = jnp.maximum(h2 + b2_ref[...], 0.0).astype(jnp.bfloat16)
    # fc3 (no activation)
    out = jnp.dot(h2, w3_ref[...], preferred_element_type=jnp.float32)
    o_ref[...] = (out + b3_ref[...]).astype(o_ref.dtype)


@functools.partial(jax.jit, static_argnames=("block_b",))
def dqn_forward(x, w1, b1, w2, b2, w3, b3, *, block_b: int = 512):
    """x: [B, state_size] float32 -> [B, action_size] float32."""
    B, S = x.shape
    H = w1.shape[1]
    A = w3.shape[1]

    # Lane-dense padded dims (multiples of 128).
    H_pad = _round_up(H, 128)
    A_pad = _round_up(A, 128)

    # Batch tile: at least 128 rows (fills MXU M-dim / vreg sublanes) but no
    # larger than needed for tiny batches.  Sized well inside v7x's 32 MiB
    # scoped VMEM even double-buffered (x-tile + out-tile ~ few hundred KiB).
    TB = min(block_b, _round_up(B, 128))
    B_pad = _round_up(B, TB)

    # bf16 compute dtype for activations / weights; f32 biases & output.
    x_p = jnp.pad(x, ((0, B_pad - B), (0, 0))).astype(jnp.bfloat16)
    w1_p = jnp.pad(w1, ((0, 0), (0, H_pad - H))).astype(jnp.bfloat16)
    b1_p = jnp.pad(b1, ((0, 0), (0, H_pad - H))).astype(jnp.float32)
    w2_p = jnp.pad(w2, ((0, H_pad - H), (0, H_pad - H))).astype(jnp.bfloat16)
    b2_p = jnp.pad(b2, ((0, 0), (0, H_pad - H))).astype(jnp.float32)
    w3_p = jnp.pad(w3, ((0, H_pad - H), (0, A_pad - A))).astype(jnp.bfloat16)
    b3_p = jnp.pad(b3, ((0, 0), (0, A_pad - A))).astype(jnp.float32)

    grid = (B_pad // TB,)

    # Weights/biases: same block every grid step -> stay resident in VMEM.
    def resident(a):
        return pl.BlockSpec(a.shape, lambda i: (0,) * a.ndim,
                            memory_space=pltpu.VMEM)

    flops = 2 * B_pad * (S * H_pad + H_pad * H_pad + H_pad * A_pad)
    bytes_accessed = (
        x_p.size * 2
        + (w1_p.size + w2_p.size + w3_p.size) * 2
        + (b1_p.size + b2_p.size + b3_p.size) * 4
        + B_pad * A_pad * 4)

    out = pl.pallas_call(
        dqn_kernel,
        out_shape=jax.ShapeDtypeStruct((B_pad, A_pad), jnp.float32),
        grid=grid,
        in_specs=[
            pl.BlockSpec((TB, S), lambda i: (i, 0), memory_space=pltpu.VMEM),
            resident(w1_p), resident(b1_p),
            resident(w2_p), resident(b2_p),
            resident(w3_p), resident(b3_p),
        ],
        out_specs=pl.BlockSpec((TB, A_pad), lambda i: (i, 0),
                               memory_space=pltpu.VMEM),
        compiler_params=pltpu.CompilerParams(
            dimension_semantics=("parallel",)),
        cost_estimate=pl.CostEstimate(
            flops=flops, transcendentals=0, bytes_accessed=bytes_accessed),
    )(x_p, w1_p, b1_p, w2_p, b2_p, w3_p, b3_p)

    # Slice padded output back to the logical shape.
    return out[:B, :A]


def init_params(key, state_size, action_size, hidden_size=64):
    """Deterministic PyTorch-style init: U(-1/sqrt(fan_in), 1/sqrt(fan_in))."""
    ks = jax.random.split(key, 6)

    def lin(kw, kb, fan_in, fan_out):
        bound = 1.0 / jnp.sqrt(fan_in)
        w = jax.random.uniform(kw, (fan_in, fan_out), jnp.float32, -bound, bound)
        b = jax.random.uniform(kb, (1, fan_out), jnp.float32, -bound, bound)
        return w, b

    w1, b1 = lin(ks[0], ks[1], state_size, hidden_size)
    w2, b2 = lin(ks[2], ks[3], hidden_size, hidden_size)
    w3, b3 = lin(ks[4], ks[5], hidden_size, action_size)
    return w1, b1, w2, b2, w3, b3


if __name__ == "__main__":
    key = jax.random.PRNGKey(0)
    k_params, k_x = jax.random.split(key)

    batch = 2
    state_size = 16
    action_size = 8
    hidden_size = 64

    w1, b1, w2, b2, w3, b3 = init_params(k_params, state_size, action_size,
                                         hidden_size)
    x = jax.random.normal(k_x, (batch, state_size), jnp.float32)

    out = dqn_forward(x, w1, b1, w2, b2, w3, b3)
    out = jax.block_until_ready(out)

    # Pure-JAX f32 reference (same semantics as the PyTorch forward).
    # Kernel runs bf16 matmuls with f32 accumulation -> loosened tolerance.
    h1 = jnp.maximum(x @ w1 + b1, 0.0)
    h2 = jnp.maximum(h1 @ w2 + b2, 0.0)
    ref = h2 @ w3 + b3
    assert out.shape == (batch, action_size)
    assert jnp.allclose(out, ref, atol=2e-2, rtol=2e-2), (
        float(jnp.max(jnp.abs(out - ref))))

    print("KERNEL_OK")
</pallas_src>

<mosaic_0001>
module attributes {stable_mosaic.version = 11 : i64} {
  func.func @dqn_kernel(%arg0: i32, %arg1: memref<128x16xbf16, #tpu.memory_space<vmem>>, %arg2: memref<16x128xbf16, #tpu.memory_space<vmem>>, %arg3: memref<1x128xf32, #tpu.memory_space<vmem>>, %arg4: memref<128x128xbf16, #tpu.memory_space<vmem>>, %arg5: memref<1x128xf32, #tpu.memory_space<vmem>>, %arg6: memref<128x128xbf16, #tpu.memory_space<vmem>>, %arg7: memref<1x128xf32, #tpu.memory_space<vmem>>, %arg8: memref<128x128xf32, #tpu.memory_space<vmem>>) attributes {dimension_semantics = [#tpu.dimension_semantics<parallel>], iteration_bounds = array<i64: 1>, scalar_prefetch = 0 : i64, scratch_operands = 0 : i64, tpu.core_type = #tpu.core_type<tc>, window_params = [{transform_indices = @transform_0, window_bounds = array<i64: 128, 16>}, {pipeline_mode = #tpu.pipeline_mode<synchronous>, transform_indices = @transform_1, window_bounds = array<i64: 16, 128>}, {pipeline_mode = #tpu.pipeline_mode<synchronous>, transform_indices = @transform_2, window_bounds = array<i64: 1, 128>}, {pipeline_mode = #tpu.pipeline_mode<synchronous>, transform_indices = @transform_3, window_bounds = array<i64: 128, 128>}, {pipeline_mode = #tpu.pipeline_mode<synchronous>, transform_indices = @transform_4, window_bounds = array<i64: 1, 128>}, {pipeline_mode = #tpu.pipeline_mode<synchronous>, transform_indices = @transform_5, window_bounds = array<i64: 128, 128>}, {pipeline_mode = #tpu.pipeline_mode<synchronous>, transform_indices = @transform_6, window_bounds = array<i64: 1, 128>}, {transform_indices = @transform_7, window_bounds = array<i64: 128, 128>}]} {
    %c0 = arith.constant 0 : index
    %c0_0 = arith.constant 0 : index
    %0 = vector.load %arg1[%c0, %c0_0] : memref<128x16xbf16, #tpu.memory_space<vmem>>, vector<128x16xbf16>
    %c0_1 = arith.constant 0 : index
    %c0_2 = arith.constant 0 : index
    %1 = vector.load %arg2[%c0_1, %c0_2] : memref<16x128xbf16, #tpu.memory_space<vmem>>, vector<16x128xbf16>
    %cst = arith.constant dense<0.000000e+00> : vector<128x128xf32>
    %2 = tpu.matmul %0, %1, %cst {dimension_numbers = #tpu.dot_dimension_numbers<[1], [0], [0], [1], [0, 0, 1, 1], [], []>} : vector<128x16xbf16>, vector<16x128xbf16>, vector<128x128xf32> -> vector<128x128xf32>
    %c0_3 = arith.constant 0 : index
    %c0_4 = arith.constant 0 : index
    %3 = vector.load %arg3[%c0_3, %c0_4] : memref<1x128xf32, #tpu.memory_space<vmem>>, vector<1x128xf32>
    %4 = vector.broadcast %3 : vector<1x128xf32> to vector<128x128xf32>
    %5 = arith.addf %2, %4 : vector<128x128xf32>
    %cst_5 = arith.constant 0.000000e+00 : f32
    %6 = vector.broadcast %cst_5 : f32 to vector<128x128xf32>
    %7 = arith.maximumf %5, %6 : vector<128x128xf32>
    %8 = arith.truncf %7 : vector<128x128xf32> to vector<128x128xbf16>
    %c0_6 = arith.constant 0 : index
    %c0_7 = arith.constant 0 : index
    %9 = vector.load %arg4[%c0_6, %c0_7] : memref<128x128xbf16, #tpu.memory_space<vmem>>, vector<128x128xbf16>
    %cst_8 = arith.constant dense<0.000000e+00> : vector<128x128xf32>
    %10 = tpu.matmul %8, %9, %cst_8 {dimension_numbers = #tpu.dot_dimension_numbers<[1], [0], [0], [1], [0, 0, 1, 1], [], []>} : vector<128x128xbf16>, vector<128x128xbf16>, vector<128x128xf32> -> vector<128x128xf32>
    %c0_9 = arith.constant 0 : index
    %c0_10 = arith.constant 0 : index
    %11 = vector.load %arg5[%c0_9, %c0_10] : memref<1x128xf32, #tpu.memory_space<vmem>>, vector<1x128xf32>
    %12 = vector.broadcast %11 : vector<1x128xf32> to vector<128x128xf32>
    %13 = arith.addf %10, %12 : vector<128x128xf32>
    %cst_11 = arith.constant 0.000000e+00 : f32
    %14 = vector.broadcast %cst_11 : f32 to vector<128x128xf32>
    %15 = arith.maximumf %13, %14 : vector<128x128xf32>
    %16 = arith.truncf %15 : vector<128x128xf32> to vector<128x128xbf16>
    %c0_12 = arith.constant 0 : index
    %c0_13 = arith.constant 0 : index
    %17 = vector.load %arg6[%c0_12, %c0_13] : memref<128x128xbf16, #tpu.memory_space<vmem>>, vector<128x128xbf16>
    %cst_14 = arith.constant dense<0.000000e+00> : vector<128x128xf32>
    %18 = tpu.matmul %16, %17, %cst_14 {dimension_numbers = #tpu.dot_dimension_numbers<[1], [0], [0], [1], [0, 0, 1, 1], [], []>} : vector<128x128xbf16>, vector<128x128xbf16>, vector<128x128xf32> -> vector<128x128xf32>
    %c0_15 = arith.constant 0 : index
    %c0_16 = arith.constant 0 : index
    %19 = vector.load %arg7[%c0_15, %c0_16] : memref<1x128xf32, #tpu.memory_space<vmem>>, vector<1x128xf32>
    %20 = vector.broadcast %19 : vector<1x128xf32> to vector<128x128xf32>
    %21 = arith.addf %18, %20 : vector<128x128xf32>
    %c0_17 = arith.constant 0 : index
    %c0_18 = arith.constant 0 : index
    %22 = vector.load %arg8[%c0_17, %c0_18] : memref<128x128xf32, #tpu.memory_space<vmem>>, vector<128x128xf32>
    tpu.vector_store %arg8[%c0_17, %c0_18], %21 {strides = array<i32>} : memref<128x128xf32, #tpu.memory_space<vmem>>, vector<128x128xf32>,
    return
  }
  func.func @transform_0(%arg0: i32) -> (i32, i32) {
    %c0_i32 = arith.constant 0 : i32
    %c0_i32_0 = arith.constant 0 : i32
    return %arg0, %c0_i32 : i32, i32
  }
  func.func @transform_1(%arg0: i32) -> (i32, i32) {
    %c0_i32 = arith.constant 0 : i32
    %c0_i32_0 = arith.constant 0 : i32
    %c0_i32_1 = arith.constant 0 : i32
    return %c0_i32, %c0_i32_0 : i32, i32
  }
  func.func @transform_2(%arg0: i32) -> (i32, i32) {
    %c0_i32 = arith.constant 0 : i32
    %c0_i32_0 = arith.constant 0 : i32
    %c0_i32_1 = arith.constant 0 : i32
    return %c0_i32, %c0_i32_0 : i32, i32
  }
  func.func @transform_3(%arg0: i32) -> (i32, i32) {
    %c0_i32 = arith.constant 0 : i32
    %c0_i32_0 = arith.constant 0 : i32
    %c0_i32_1 = arith.constant 0 : i32
    return %c0_i32, %c0_i32_0 : i32, i32
  }
  func.func @transform_4(%arg0: i32) -> (i32, i32) {
    %c0_i32 = arith.constant 0 : i32
    %c0_i32_0 = arith.constant 0 : i32
    %c0_i32_1 = arith.constant 0 : i32
    return %c0_i32, %c0_i32_0 : i32, i32
  }
  func.func @transform_5(%arg0: i32) -> (i32, i32) {
    %c0_i32 = arith.constant 0 : i32
    %c0_i32_0 = arith.constant 0 : i32
    %c0_i32_1 = arith.constant 0 : i32
    return %c0_i32, %c0_i32_0 : i32, i32
  }
  func.func @transform_6(%arg0: i32) -> (i32, i32) {
    %c0_i32 = arith.constant 0 : i32
    %c0_i32_0 = arith.constant 0 : i32
    %c0_i32_1 = arith.constant 0 : i32
    return %c0_i32, %c0_i32_0 : i32, i32
  }
  func.func @transform_7(%arg0: i32) -> (i32, i32) {
    %c0_i32 = arith.constant 0 : i32
    %c0_i32_0 = arith.constant 0 : i32
    return %arg0, %c0_i32 : i32, i32
  }
}

</mosaic_0001>

<bundles_post_ra>
// kernel: dqn_forward.1
= control target key start
LH: loop header
LB: loop body
LE: loop exit
PB: predicated region body
PF: predicated region fallthrough
CT: control target
= control target key end

     0   :  { %vm98_vm0 = vcmask 130048   ;;  %s988_s1 = inlined_call_operand.vmem [shape: bf16[16,128], index: 1, kind: input, shape index: {}]   ;;  %s989_s0 = inlined_call_operand.vmem [shape: bf16[128,16], index: 0, kind: input, shape index: {}]   ;;  %s990_s3 = inlined_call_operand.vmem [shape: bf16[128,128], index: 3, kind: input, shape index: {}]   ;;  %s991_s5 = inlined_call_operand.vmem [shape: bf16[128,128], index: 5, kind: input, shape index: {}]   ;;  %s992_s2 = inlined_call_operand.vmem [shape: f32[1,128], index: 2, kind: input, shape index: {}]   ;;  %s993_s4 = inlined_call_operand.vmem [shape: f32[1,128], index: 4, kind: input, shape index: {}]   ;;  %s994_s6 = inlined_call_operand.vmem [shape: f32[1,128], index: 6, kind: input, shape index: {}]   ;;  %s995_s7 = inlined_call_operand.vmem [shape: f32[128,128], index: 7, kind: output, shape index: {}]  }
   0x1   :  { %v783_v0 = vld [vmem:[%s988_s1] sm:$0xff]   ;;  %v785_v2 = vld [vmem:[%s989_s0 + $0x8] sm:$0xff]   ;;  %v786_v3 = vld [vmem:[%s989_s0 + $0x10] sm:$0xff]  }
   0x2   :  { %v784_v1 = vld [vmem:[%s989_s0] sm:$0xff]   ;;  %701 = vmatprep.subr.bf16.mxu0 %v783_v0  ;;  %v787_v4 = vld [vmem:[%s989_s0 + $0x18] sm:$0xff]   ;;  %v793_v6 = vld [vmem:[%s990_s3 + $0x8] sm:$0xff]  }
   0x3   :  { %702 = vmatpush3.bf16.msra.mxu0 %v783_v0  ;;  %703 = vmatprep.mubr.msk.bf16.mxu0 %vm98_vm0, %v784_v1  ;;  %v792_v5 = vld [vmem:[%s990_s3] sm:$0xff]   ;;  %v794_v8 = vld [vmem:[%s990_s3 + $0x10] sm:$0xff]   ;;  %v795_v9 = vld [vmem:[%s990_s3 + $0x18] sm:$0xff]  }
   0x4   :  { %v788_v7 = vld [vmem:[%s989_s0 + $0x20] sm:$0xff]   ;;  %719 = vmatprep.subr.bf16.mxu1 %v792_v5  ;;  %v789_v10 = vld [vmem:[%s989_s0 + $0x28] sm:$0xff]   ;;  %v790_v11 = vld [vmem:[%s989_s0 + $0x30] sm:$0xff]  }
   0x5   :  { %720 = vmatpush3.bf16.msra.mxu1 %v792_v5  ;;  %v796_v12 = vld [vmem:[%s990_s3 + $0x20] sm:$0xff]   ;;  %v797_v13 = vld [vmem:[%s990_s3 + $0x28] sm:$0xff]   ;;  %v791_v14 = vld [vmem:[%s989_s0 + $0x38] sm:$0xff]  }
   0x6   :  { %704 = vmatmul.mubr.msk.bf16.vlgmr.msra.gmra.mrb[0].mxu0 %vm98_vm0, %v785_v2  ;;  %721 = vmatprep.subr.bf16.mxu1 %v793_v6  ;;  %v798_v15 = vld [vmem:[%s990_s3 + $0x30] sm:$0xff]   ;;  %v799_v16 = vld [vmem:[%s990_s3 + $0x38] sm:$0xff]   ;;  %v800_v17 = vld [vmem:[%s991_s5] sm:$0xff]  }
   0x7   :  { %707 = vmatprep.mubr.msk.bf16.mxu0 %vm98_vm0, %v786_v3  ;;  %v801_v18 = vld [vmem:[%s991_s5 + $0x8] sm:$0xff]   ;;  %751 = vmatprep.subr.bf16.mxu0 %v800_v17  ;;  %v802_v19 = vld [vmem:[%s991_s5 + $0x10] sm:$0xff]   ;;  %v803_v20 = vld [vmem:[%s991_s5 + $0x18] sm:$0xff]  }
   0x8   :  { %752 = vmatpush3.bf16.msra.mxu0 %v800_v17  ;;  %v804_v21 = vld [vmem:[%s991_s5 + $0x20] sm:$0xff]   ;;  %v805_v22 = vld [vmem:[%s991_s5 + $0x28] sm:$0xff]   ;;  %v807_v17 = vld [vmem:[%s991_s5 + $0x38] sm:$0xff]  }
   0x9   :  { %722 = vmatpush3.bf16.msra.mxu1 %v793_v6  ;;  %753 = vmatprep.subr.bf16.mxu0 %v801_v18  ;;  %v624_v23 = vld [vmem:[%s992_s2] ss:$0 sm:$0xff] }
   0xa   :  { %723 = vmatprep.subr.bf16.mxu1 %v794_v8 }
   0xc   :  { %754 = vmatpush3.bf16.msra.mxu0 %v801_v18  ;;  %v642_v18 = vld [vmem:[%s993_s4] ss:$0 sm:$0xff] }
   0xd   :  { %724 = vmatpush3.bf16.msra.mxu1 %v794_v8  ;;  %755 = vmatprep.subr.bf16.mxu0 %v802_v19 }
   0xe   :  { %708 = vmatmul.mubr.msk.bf16.gmra.mrb[4].mxu0 %vm98_vm0, %v787_v4  ;;  %725 = vmatprep.subr.bf16.mxu1 %v795_v9 }
   0xf   :  { %711 = vmatprep.mubr.msk.bf16.mxu0 %vm98_vm0, %v788_v7 }
  0x10   :  { %756 = vmatpush3.bf16.msra.mxu0 %v802_v19 }
  0x11   :  { %726 = vmatpush3.bf16.msra.mxu1 %v795_v9  ;;  %757 = vmatprep.subr.bf16.mxu0 %v803_v20 }
  0x12   :  { %727 = vmatprep.subr.bf16.mxu1 %v796_v12 }
  0x14   :  { %758 = vmatpush3.bf16.msra.mxu0 %v803_v20 }
  0x15   :  { %728 = vmatpush3.bf16.msra.mxu1 %v796_v12  ;;  %759 = vmatprep.subr.bf16.mxu0 %v804_v21 }
  0x16   :  { %712 = vmatmul.mubr.msk.bf16.gmra.mrb[8].mxu0 %vm98_vm0, %v789_v10  ;;  %729 = vmatprep.subr.bf16.mxu1 %v797_v13 }
  0x17   :  { %715 = vmatprep.mubr.msk.bf16.mxu0 %vm98_vm0, %v790_v11 }
  0x18   :  { %760 = vmatpush3.bf16.msra.mxu0 %v804_v21 }
  0x19   :  { %730 = vmatpush3.bf16.msra.mxu1 %v797_v13  ;;  %761 = vmatprep.subr.bf16.mxu0 %v805_v22 }
  0x1a   :  { %731 = vmatprep.subr.bf16.mxu1 %v798_v15 }
  0x1c   :  { %762 = vmatpush3.bf16.msra.mxu0 %v805_v22 }
  0x1d   :  { %732 = vmatpush3.bf16.msra.mxu1 %v798_v15 }
  0x1e   :  { %716 = vmatmul.mubr.msk.bf16.gmra.mrb[12].mxu0 %vm98_vm0, %v791_v14  ;;  %733 = vmatprep.subr.bf16.mxu1 %v799_v16 }
  0x21   :  { %734 = vmatpush3.bf16.msra.mxu1 %v799_v16  ;;  %v806_v16 = vld [vmem:[%s991_s5 + $0x30] sm:$0xff]  }
  0x22   :  { %763 = vmatprep.subr.bf16.mxu0 %v806_v16 }
  0x23   :  { %764 = vmatpush3.bf16.msra.mxu0 %v806_v16 }
  0x24   :  { %765 = vmatprep.subr.bf16.mxu0 %v807_v17 }
  0x27   :  { %766 = vmatpush3.bf16.msra.mxu0 %v807_v17 }
  0xd9   :  { %v705_v24 = vpop.f32.mrb[0].mxu0 }
  0xda   :  { %v166_v25 = vadd.f32 %v705_v24, %v624_v23  ;;  %v157_v26 = vpop.f32.mrb[1].mxu0 }
  0xdb   :  { %v158_v27 = vadd.f32 %v624_v23, %v157_v26  ;;  %v706_v28 = vpop.f32.mrb[2].mxu0 }
  0xdc   :  { %v169_v29 = vadd.f32 %v706_v28, %v624_v23  ;;  %v160_v30 = vpop.f32.mrb[3].mxu0  ;;  %v222_v32 = vmax.f32 %v166_v25, 0.0 }
  0xdd   :  { %v161_v31 = vadd.f32 %v624_v23, %v160_v30  ;;  %v220_v34 = vmax.f32 %v158_v27, 0.0 }
  0xde   :  { %v223_v33 = vmax.f32 %v169_v29, 0.0 }
  0xdf   :  { %v221_v35 = vmax.f32 %v161_v31, 0.0 }
  0xe0   :  { %v237_v36 = vpack.c.bf16 %v223_v33, %v222_v32 }
  0xe1   :  { %v709_v37 = vpop.f32.mrb[4].mxu0  ;;  %v236_v38 = vpack.c.bf16 %v221_v35, %v220_v34 }
  0xe2   :  { %v182_v39 = vadd.f32 %v709_v37, %v624_v23  ;;  %v173_v40 = vpop.f32.mrb[5].mxu0 }
  0xe3   :  { %v174_v41 = vadd.f32 %v624_v23, %v173_v40  ;;  %v710_v42 = vpop.f32.mrb[6].mxu0  ;;  %735 = vmatprep.mubr.bf16.mxu1 %v236_v38 }
  0xe4   :  { %v185_v43 = vadd.f32 %v710_v42, %v624_v23  ;;  %v176_v44 = vpop.f32.mrb[7].mxu0  ;;  %736 = vmatmul.mubr.bf16.vlgmr.msra.gmra.mrb[0].mxu1 %v237_v36  ;;  %v226_v46 = vmax.f32 %v182_v39, 0.0 }
  0xe5   :  { %v177_v45 = vadd.f32 %v624_v23, %v176_v44  ;;  %v224_v48 = vmax.f32 %v174_v41, 0.0 }
  0xe6   :  { %v227_v47 = vmax.f32 %v185_v43, 0.0 }
  0xe7   :  { %v225_v49 = vmax.f32 %v177_v45, 0.0 }
  0xe8   :  { %v239_v50 = vpack.c.bf16 %v227_v47, %v226_v46 }
  0xe9   :  { %v238_v51 = vpack.c.bf16 %v225_v49, %v224_v48  ;;  %v713_v52 = vpop.f32.mrb[8].mxu0 }
  0xea   :  { %v198_v53 = vadd.f32 %v713_v52, %v624_v23  ;;  %v189_v54 = vpop.f32.mrb[9].mxu0 }
  0xeb   :  { %v190_v55 = vadd.f32 %v624_v23, %v189_v54  ;;  %v714_v56 = vpop.f32.mrb[10].mxu0  ;;  %739 = vmatprep.mubr.bf16.mxu1 %v238_v51 }
  0xec   :  { %v201_v57 = vadd.f32 %v714_v56, %v624_v23  ;;  %v192_v58 = vpop.f32.mrb[11].mxu0  ;;  %740 = vmatmul.mubr.bf16.gmra.mrb[4].mxu1 %v239_v50  ;;  %v230_v60 = vmax.f32 %v198_v53, 0.0 }
  0xed   :  { %v193_v59 = vadd.f32 %v624_v23, %v192_v58  ;;  %v228_v62 = vmax.f32 %v190_v55, 0.0 }
  0xee   :  { %v231_v61 = vmax.f32 %v201_v57, 0.0 }
  0xef   :  { %v229_v63 = vmax.f32 %v193_v59, 0.0 }
  0xf0   :  { %v241_v0 = vpack.c.bf16 %v231_v61, %v230_v60 }
  0xf1   :  { %v240_v1 = vpack.c.bf16 %v229_v63, %v228_v62  ;;  %v717_v2 = vpop.f32.mrb[12].mxu0 }
  0xf2   :  { %v214_v3 = vadd.f32 %v717_v2, %v624_v23  ;;  %v205_v4 = vpop.f32.mrb[13].mxu0 }
  0xf3   :  { %v206_v5 = vadd.f32 %v624_v23, %v205_v4  ;;  %v718_v6 = vpop.f32.mrb[14].mxu0  ;;  %743 = vmatprep.mubr.bf16.mxu1 %v240_v1 }
  0xf4   :  { %v217_v7 = vadd.f32 %v718_v6, %v624_v23  ;;  %v208_v8 = vpop.f32.mrb[15].mxu0  ;;  %744 = vmatmul.mubr.bf16.gmra.mrb[8].mxu1 %v241_v0  ;;  %v234_v10 = vmax.f32 %v214_v3, 0.0 }
  0xf5   :  { %v209_v9 = vadd.f32 %v624_v23, %v208_v8  ;;  %v232_v12 = vmax.f32 %v206_v5, 0.0 }
  0xf6   :  { %v235_v11 = vmax.f32 %v217_v7, 0.0 }
  0xf7   :  { %v233_v13 = vmax.f32 %v209_v9, 0.0 }
  0xf8   :  { %v243_v14 = vpack.c.bf16 %v235_v11, %v234_v10  ;;  %v651_v11 = vld [vmem:[%s994_s6] ss:$0 sm:$0xff] }
  0xf9   :  { %v242_v15 = vpack.c.bf16 %v233_v13, %v232_v12 }
  0xfb   :  { %747 = vmatprep.mubr.bf16.mxu1 %v242_v15 }
  0xfc   :  { %748 = vmatmul.mubr.bf16.gmra.mrb[12].mxu1 %v243_v14 }
 0x1b7   :  { %v737_v19 = vpop.f32.mrb[0].mxu1 }
 0x1b8   :  { %v358_v20 = vadd.f32 %v737_v19, %v642_v18  ;;  %v349_v21 = vpop.f32.mrb[1].mxu1 }
 0x1b9   :  { %v350_v22 = vadd.f32 %v642_v18, %v349_v21  ;;  %v738_v23 = vpop.f32.mrb[2].mxu1 }
 0x1ba   :  { %v361_v24 = vadd.f32 %v738_v23, %v642_v18  ;;  %v352_v25 = vpop.f32.mrb[3].mxu1  ;;  %v414_v27 = vmax.f32 %v358_v20, 0.0 }
 0x1bb   :  { %v353_v26 = vadd.f32 %v642_v18, %v352_v25  ;;  %v412_v29 = vmax.f32 %v350_v22, 0.0 }
 0x1bc   :  { %v415_v28 = vmax.f32 %v361_v24, 0.0 }
 0x1bd   :  { %v413_v30 = vmax.f32 %v353_v26, 0.0 }
 0x1be   :  { %v429_v31 = vpack.c.bf16 %v415_v28, %v414_v27 }
 0x1bf   :  { %v428_v32 = vpack.c.bf16 %v413_v30, %v412_v29  ;;  %v741_v33 = vpop.f32.mrb[4].mxu1 }
 0x1c0   :  { %v374_v34 = vadd.f32 %v741_v33, %v642_v18  ;;  %v365_v35 = vpop.f32.mrb[5].mxu1 }
 0x1c1   :  { %v366_v36 = vadd.f32 %v642_v18, %v365_v35  ;;  %v742_v37 = vpop.f32.mrb[6].mxu1  ;;  %767 = vmatprep.mubr.bf16.mxu0 %v428_v32 }
 0x1c2   :  { %v377_v38 = vadd.f32 %v742_v37, %v642_v18  ;;  %v368_v39 = vpop.f32.mrb[7].mxu1  ;;  %768 = vmatmul.mubr.bf16.vlgmr.msra.gmra.mrb[16].mxu0 %v429_v31  ;;  %v418_v41 = vmax.f32 %v374_v34, 0.0 }
 0x1c3   :  { %v369_v40 = vadd.f32 %v642_v18, %v368_v39  ;;  %v416_v43 = vmax.f32 %v366_v36, 0.0 }
 0x1c4   :  { %v419_v42 = vmax.f32 %v377_v38, 0.0 }
 0x1c5   :  { %v417_v44 = vmax.f32 %v369_v40, 0.0 }
 0x1c6   :  { %v431_v45 = vpack.c.bf16 %v419_v42, %v418_v41 }
 0x1c7   :  { %v430_v46 = vpack.c.bf16 %v417_v44, %v416_v43  ;;  %v745_v47 = vpop.f32.mrb[8].mxu1 }
 0x1c8   :  { %v390_v48 = vadd.f32 %v745_v47, %v642_v18  ;;  %v381_v49 = vpop.f32.mrb[9].mxu1 }
 0x1c9   :  { %v382_v50 = vadd.f32 %v642_v18, %v381_v49  ;;  %v746_v51 = vpop.f32.mrb[10].mxu1  ;;  %771 = vmatprep.mubr.bf16.mxu0 %v430_v46 }
 0x1ca   :  { %v393_v52 = vadd.f32 %v746_v51, %v642_v18  ;;  %v384_v53 = vpop.f32.mrb[11].mxu1  ;;  %772 = vmatmul.mubr.bf16.gmra.mrb[20].mxu0 %v431_v45  ;;  %v422_v55 = vmax.f32 %v390_v48, 0.0 }
 0x1cb   :  { %v385_v54 = vadd.f32 %v642_v18, %v384_v53  ;;  %v420_v57 = vmax.f32 %v382_v50, 0.0 }
 0x1cc   :  { %v423_v56 = vmax.f32 %v393_v52, 0.0 }
 0x1cd   :  { %v421_v58 = vmax.f32 %v385_v54, 0.0 }
 0x1ce   :  { %v433_v59 = vpack.c.bf16 %v423_v56, %v422_v55 }
 0x1cf   :  { %v432_v60 = vpack.c.bf16 %v421_v58, %v420_v57  ;;  %v749_v61 = vpop.f32.mrb[12].mxu1 }
 0x1d0   :  { %v406_v62 = vadd.f32 %v749_v61, %v642_v18  ;;  %v397_v63 = vpop.f32.mrb[13].mxu1 }
 0x1d1   :  { %v398_v0 = vadd.f32 %v642_v18, %v397_v63  ;;  %v750_v1 = vpop.f32.mrb[14].mxu1  ;;  %775 = vmatprep.mubr.bf16.mxu0 %v432_v60 }
 0x1d2   :  { %v409_v2 = vadd.f32 %v750_v1, %v642_v18  ;;  %v400_v3 = vpop.f32.mrb[15].mxu1  ;;  %776 = vmatmul.mubr.bf16.gmra.mrb[24].mxu0 %v433_v59  ;;  %v426_v5 = vmax.f32 %v406_v62, 0.0 }
 0x1d3   :  { %v401_v4 = vadd.f32 %v642_v18, %v400_v3  ;;  %v424_v7 = vmax.f32 %v398_v0, 0.0 }
 0x1d4   :  { %v427_v6 = vmax.f32 %v409_v2, 0.0 }
 0x1d5   :  { %v425_v8 = vmax.f32 %v401_v4, 0.0 }
 0x1d6   :  { %v435_v9 = vpack.c.bf16 %v427_v6, %v426_v5 }
 0x1d7   :  { %v434_v10 = vpack.c.bf16 %v425_v8, %v424_v7 }
 0x1d9   :  { %779 = vmatprep.mubr.bf16.mxu0 %v434_v10 }
 0x1da   :  { %780 = vmatmul.mubr.bf16.gmra.mrb[28].mxu0 %v435_v9 }
 0x295   :  { %v769_v12 = vpop.f32.mrb[16].mxu0 }
 0x296   :  { %v550_v13 = vadd.f32 %v769_v12, %v651_v11  ;;  %v541_v14 = vpop.f32.mrb[17].mxu0 }
 0x297   :  { %v542_v15 = vadd.f32 %v651_v11, %v541_v14  ;;  %v770_v16 = vpop.f32.mrb[18].mxu0 }
 0x298   :  { %606 = vst [vmem:[%s995_s7 + $0x10] sm:$0xff] %v550_v13  ;;  %v553_v17 = vadd.f32 %v770_v16, %v651_v11  ;;  %v544_v18 = vpop.f32.mrb[19].mxu0 }
 0x299   :  { %604 = vst [vmem:[%s995_s7] sm:$0xff] %v542_v15  ;;  %v545_v19 = vadd.f32 %v651_v11, %v544_v18 }
 0x29a   :  { %607 = vst [vmem:[%s995_s7 + $0x18] sm:$0xff] %v553_v17 }
 0x29b   :  { %605 = vst [vmem:[%s995_s7 + $0x8] sm:$0xff] %v545_v19 }
 0x29d   :  { %v773_v20 = vpop.f32.mrb[20].mxu0 }
 0x29e   :  { %v566_v21 = vadd.f32 %v773_v20, %v651_v11  ;;  %v557_v22 = vpop.f32.mrb[21].mxu0 }
 0x29f   :  { %v558_v23 = vadd.f32 %v651_v11, %v557_v22  ;;  %v774_v24 = vpop.f32.mrb[22].mxu0 }
 0x2a0   :  { %610 = vst [vmem:[%s995_s7 + $0x30] sm:$0xff] %v566_v21  ;;  %v569_v25 = vadd.f32 %v774_v24, %v651_v11  ;;  %v560_v26 = vpop.f32.mrb[23].mxu0 }
 0x2a1   :  { %608 = vst [vmem:[%s995_s7 + $0x20] sm:$0xff] %v558_v23  ;;  %v561_v27 = vadd.f32 %v651_v11, %v560_v26 }
 0x2a2   :  { %611 = vst [vmem:[%s995_s7 + $0x38] sm:$0xff] %v569_v25 }
 0x2a3   :  { %609 = vst [vmem:[%s995_s7 + $0x28] sm:$0xff] %v561_v27 }
 0x2a5   :  { %v777_v28 = vpop.f32.mrb[24].mxu0 }
 0x2a6   :  { %v582_v29 = vadd.f32 %v777_v28, %v651_v11  ;;  %v573_v30 = vpop.f32.mrb[25].mxu0 }
 0x2a7   :  { %v574_v31 = vadd.f32 %v651_v11, %v573_v30  ;;  %v778_v32 = vpop.f32.mrb[26].mxu0 }
 0x2a8   :  { %614 = vst [vmem:[%s995_s7 + $0x50] sm:$0xff] %v582_v29  ;;  %v585_v33 = vadd.f32 %v778_v32, %v651_v11  ;;  %v576_v34 = vpop.f32.mrb[27].mxu0 }
 0x2a9   :  { %612 = vst [vmem:[%s995_s7 + $0x40] sm:$0xff] %v574_v31  ;;  %v577_v35 = vadd.f32 %v651_v11, %v576_v34 }
 0x2aa   :  { %615 = vst [vmem:[%s995_s7 + $0x58] sm:$0xff] %v585_v33 }
 0x2ab   :  { %613 = vst [vmem:[%s995_s7 + $0x48] sm:$0xff] %v577_v35 }
 0x2ad   :  { %v781_v36 = vpop.f32.mrb[28].mxu0 }
 0x2ae   :  { %v598_v37 = vadd.f32 %v781_v36, %v651_v11  ;;  %v589_v38 = vpop.f32.mrb[29].mxu0 }
 0x2af   :  { %v590_v39 = vadd.f32 %v651_v11, %v589_v38  ;;  %v782_v40 = vpop.f32.mrb[30].mxu0 }
 0x2b0   :  { %618 = vst [vmem:[%s995_s7 + $0x70] sm:$0xff] %v598_v37  ;;  %v601_v41 = vadd.f32 %v782_v40, %v651_v11  ;;  %v592_v42 = vpop.f32.mrb[31].mxu0 }
 0x2b1   :  { %616 = vst [vmem:[%s995_s7 + $0x60] sm:$0xff] %v590_v39  ;;  %v593_v43 = vadd.f32 %v651_v11, %v592_v42 }
 0x2b2   :  { %619 = vst [vmem:[%s995_s7 + $0x78] sm:$0xff] %v601_v41 }
 0x2b3   :  { %617 = vst [vmem:[%s995_s7 + $0x68] sm:$0xff] %v593_v43 }

</bundles_post_ra>
